<compile_context>
chip_gen: v6e
topology: v6e:2x2x1
jax: 0.10.0
libtpu: 0.0.40
codegen_flags: <defaults>
</compile_context>

<pallas_src>
import jax
import jax.numpy as jnp
import numpy as np
from jax.experimental import pallas as pl
from jax.experimental.pallas import tpu as pltpu

GROUP = 3 * 128  # one lane-row = 128 whole (x, y, z) vertices


# ----------------------------------------------------------------------------
# Pallas kernel: 5-tap lane-FIR implementing  out = sR @ vertex + t
# ----------------------------------------------------------------------------
def transform_kernel(w_ref, m_ref, o_ref):
    m = m_ref[...]          # (BR, 384) f32, interleaved x,y,z stream
    w = w_ref[...]          # (6, 384): rows = W_-2, W_-1, W_0, W_+1, W_+2, T

    n = m.shape[-1]

    def tap(d):             # tap(d)[r, l] = m[r, (l + d) % n]
        return pltpu.roll(m, (-d) % n, axis=1)

    out = (w[0:1, :] * tap(-2)
           + w[1:2, :] * tap(-1)
           + w[2:3, :] * m
           + w[3:4, :] * tap(1)
           + w[4:5, :] * tap(2)
           + w[5:6, :])
    o_ref[...] = out.astype(o_ref.dtype)


# ----------------------------------------------------------------------------
# FIR weight construction (tiny, runs fused in the jitted wrapper)
# ----------------------------------------------------------------------------
def _fir_weights(sR, t):
    """Per-lane weights (6, GROUP): W_d[l] = sR[c, c+d] (0 if out of range),
    last row is t[c], with c = l % 3.  All index patterns are static."""
    c = np.arange(GROUP) % 3
    rows = []
    for d in (-2, -1, 0, 1, 2):
        j = c + d
        valid = jnp.asarray((j >= 0) & (j <= 2))
        jc = np.clip(j, 0, 2)
        rows.append(jnp.where(valid, sR[c, jc], 0.0))
    rows.append(t.reshape(3)[c])
    return jnp.stack(rows, axis=0).astype(jnp.float32)   # (6, GROUP)


# ----------------------------------------------------------------------------
# Wrapper
# ----------------------------------------------------------------------------
def transform_pallas(mesh, sR, t, *, block_rows=1024):
    """mesh: (bs, v_num, 3) f32, sR: (3, 3), t: (3, 1) -> (bs, v_num, 3)."""
    bs, v_num, d = mesh.shape
    assert d == 3
    total = bs * v_num * 3

    flat = mesh.astype(jnp.float32).reshape(total)        # contiguous -> free
    padded = pl.cdiv(total, GROUP) * GROUP
    if padded != total:
        # TODO(synk): this pad is one extra HBM copy; only hit when
        # bs*v_num*3 is not a multiple of 384 (e.g. the real 35709-vertex BFM).
        flat = jnp.pad(flat, (0, padded - total))
    rows = padded // GROUP

    if rows <= block_rows:
        br = rows                                  # single full-extent block
    else:
        br = max(8, (block_rows // 8) * 8)         # sublane-aligned block rows

    grid = (pl.cdiv(rows, br),)
    weights = _fir_weights(sR, t)                  # tiny (6, 384)
    m2d = flat.reshape(rows, GROUP)                # contiguous -> free

    out2d = pl.pallas_call(
        transform_kernel,
        out_shape=jax.ShapeDtypeStruct((rows, GROUP), jnp.float32),
        grid=grid,
        in_specs=[
            pl.BlockSpec((6, GROUP), lambda i: (0, 0)),    # weights (resident)
            pl.BlockSpec((br, GROUP), lambda i: (i, 0)),   # mesh slab
        ],
        out_specs=pl.BlockSpec((br, GROUP), lambda i: (i, 0)),
        compiler_params=pltpu.CompilerParams(
            dimension_semantics=("parallel",),
            vmem_limit_bytes=48 * 1024 * 1024,
        ),
    )(weights, m2d)

    out_flat = out2d.reshape(padded)
    if padded != total:
        out_flat = out_flat[:total]
    return out_flat.reshape(bs, v_num, 3)


# ----------------------------------------------------------------------------
# Euler rotation matrix (tiny 3x3 glue, plain JAX) + jitted forward
# ----------------------------------------------------------------------------
def get_euler_R(p_y_r):
    c = jnp.cos(p_y_r)
    s = jnp.sin(p_y_r)
    one = jnp.float32(1.0)
    zero = jnp.float32(0.0)
    Rx = jnp.array([[one, zero, zero],
                    [zero, c[0], s[0]],
                    [zero, -s[0], c[0]]], dtype=jnp.float32)
    Ry = jnp.array([[c[1], zero, s[1]],
                    [zero, one, zero],
                    [-s[1], zero, c[1]]], dtype=jnp.float32)
    Rz = jnp.array([[c[2], s[2], zero],
                    [-s[2], c[2], zero],
                    [zero, zero, one]], dtype=jnp.float32)
    return Rz @ (Ry @ Rx)


@jax.jit
def _transform_forward(mesh, p_y_r, s, t):
    """Whole forward under one jit so reshapes/pads fuse with the pallas call."""
    sR = get_euler_R(p_y_r) * s[0]                 # (3, 3)
    return transform_pallas(mesh, sR, t)


class TransformPallas:
    """Euler-mode Transform with deterministically initialized parameters."""

    def __init__(self, key):
        # torch.rand(3) * 1e-9  -> deterministic uniform in-script
        self.p_y_r = jax.random.uniform(key, (3,), dtype=jnp.float32) * 1e-9
        self.s = jnp.array([0.09549354], dtype=jnp.float32)
        self.t = jnp.array([[0.00132487, -0.02791605, -0.08785161]],
                           dtype=jnp.float32).T            # (3, 1)

    def __call__(self, mesh, use_batch=True):
        if not use_batch:
            mesh = mesh[None]
        out = _transform_forward(mesh, self.p_y_r, self.s, self.t)
        if not use_batch:
            out = out[0]
        return out


if __name__ == "__main__":
    key = jax.random.PRNGKey(0)
    k_param, k_m1, k_m2, k_m3 = jax.random.split(key, 4)

    module = TransformPallas(k_param)

    def reference(mesh):
        sR = get_euler_R(module.p_y_r) * module.s[0]
        return mesh @ sR.T + module.t.T

    # aligned case: bs*v_num*3 is a multiple of 384 -> zero-copy path
    mesh = jax.random.normal(k_m1, (2, 256, 3), dtype=jnp.float32)
    out = jax.block_until_ready(module(mesh))
    np.testing.assert_allclose(np.asarray(out), np.asarray(reference(mesh)),
                               rtol=1e-5, atol=1e-5)
    assert out.shape == mesh.shape

    # ragged case: exercises the pad + tail-slice path
    mesh_r = jax.random.normal(k_m2, (2, 100, 3), dtype=jnp.float32)
    out_r = jax.block_until_ready(module(mesh_r))
    np.testing.assert_allclose(np.asarray(out_r), np.asarray(reference(mesh_r)),
                               rtol=1e-5, atol=1e-5)

    # unbatched path
    mesh_u = jax.random.normal(k_m3, (128, 3), dtype=jnp.float32)
    out_u = jax.block_until_ready(module(mesh_u, use_batch=False))
    np.testing.assert_allclose(np.asarray(out_u), np.asarray(reference(mesh_u)),
                               rtol=1e-5, atol=1e-5)

    print("KERNEL_OK")
</pallas_src>

<mosaic_0001>
module attributes {stable_mosaic.version = 11 : i64} {
  func.func @transform_kernel(%arg0: i32, %arg1: memref<6x384xf32, #tpu.memory_space<vmem>>, %arg2: memref<4x384xf32, #tpu.memory_space<vmem>>, %arg3: memref<4x384xf32, #tpu.memory_space<vmem>>) attributes {dimension_semantics = [#tpu.dimension_semantics<parallel>], iteration_bounds = array<i64: 1>, scalar_prefetch = 0 : i64, scratch_operands = 0 : i64, tpu.core_type = #tpu.core_type<tc>, window_params = [{pipeline_mode = #tpu.pipeline_mode<synchronous>, transform_indices = @transform_0, window_bounds = array<i64: 6, 384>}, {transform_indices = @transform_1, window_bounds = array<i64: 4, 384>}, {transform_indices = @transform_2, window_bounds = array<i64: 4, 384>}]} {
    %c0 = arith.constant 0 : index
    %c0_0 = arith.constant 0 : index
    %0 = vector.load %arg2[%c0, %c0_0] : memref<4x384xf32, #tpu.memory_space<vmem>>, vector<4x384xf32>
    %c0_1 = arith.constant 0 : index
    %c0_2 = arith.constant 0 : index
    %1 = vector.load %arg1[%c0_1, %c0_2] : memref<6x384xf32, #tpu.memory_space<vmem>>, vector<6x384xf32>
    %2 = vector.extract_strided_slice %1 {offsets = [0, 0], sizes = [1, 384], strides = [1, 1]} : vector<6x384xf32> to vector<1x384xf32>
    %c2_i32 = arith.constant 2 : i32
    %3 = tpu.dynamic_rotate %0 by %c2_i32 dim 1 : vector<4x384xf32>, i32 -> vector<4x384xf32>
    %4 = vector.broadcast %2 : vector<1x384xf32> to vector<4x384xf32>
    %5 = arith.mulf %4, %3 : vector<4x384xf32>
    %6 = vector.extract_strided_slice %1 {offsets = [1, 0], sizes = [1, 384], strides = [1, 1]} : vector<6x384xf32> to vector<1x384xf32>
    %c1_i32 = arith.constant 1 : i32
    %7 = tpu.dynamic_rotate %0 by %c1_i32 dim 1 : vector<4x384xf32>, i32 -> vector<4x384xf32>
    %8 = vector.broadcast %6 : vector<1x384xf32> to vector<4x384xf32>
    %9 = arith.mulf %8, %7 : vector<4x384xf32>
    %10 = arith.addf %5, %9 : vector<4x384xf32>
    %11 = vector.extract_strided_slice %1 {offsets = [2, 0], sizes = [1, 384], strides = [1, 1]} : vector<6x384xf32> to vector<1x384xf32>
    %12 = vector.broadcast %11 : vector<1x384xf32> to vector<4x384xf32>
    %13 = arith.mulf %12, %0 : vector<4x384xf32>
    %14 = arith.addf %10, %13 : vector<4x384xf32>
    %15 = vector.extract_strided_slice %1 {offsets = [3, 0], sizes = [1, 384], strides = [1, 1]} : vector<6x384xf32> to vector<1x384xf32>
    %c383_i32 = arith.constant 383 : i32
    %16 = tpu.dynamic_rotate %0 by %c383_i32 dim 1 : vector<4x384xf32>, i32 -> vector<4x384xf32>
    %17 = vector.broadcast %15 : vector<1x384xf32> to vector<4x384xf32>
    %18 = arith.mulf %17, %16 : vector<4x384xf32>
    %19 = arith.addf %14, %18 : vector<4x384xf32>
    %20 = vector.extract_strided_slice %1 {offsets = [4, 0], sizes = [1, 384], strides = [1, 1]} : vector<6x384xf32> to vector<1x384xf32>
    %c382_i32 = arith.constant 382 : i32
    %21 = tpu.dynamic_rotate %0 by %c382_i32 dim 1 : vector<4x384xf32>, i32 -> vector<4x384xf32>
    %22 = vector.broadcast %20 : vector<1x384xf32> to vector<4x384xf32>
    %23 = arith.mulf %22, %21 : vector<4x384xf32>
    %24 = arith.addf %19, %23 : vector<4x384xf32>
    %25 = vector.extract_strided_slice %1 {offsets = [5, 0], sizes = [1, 384], strides = [1, 1]} : vector<6x384xf32> to vector<1x384xf32>
    %26 = vector.broadcast %25 : vector<1x384xf32> to vector<4x384xf32>
    %27 = arith.addf %24, %26 : vector<4x384xf32>
    %c0_3 = arith.constant 0 : index
    %c0_4 = arith.constant 0 : index
    %28 = vector.load %arg3[%c0_3, %c0_4] : memref<4x384xf32, #tpu.memory_space<vmem>>, vector<4x384xf32>
    tpu.vector_store %arg3[%c0_3, %c0_4], %27 {strides = array<i32>} : memref<4x384xf32, #tpu.memory_space<vmem>>, vector<4x384xf32>,
    return
  }
  func.func @transform_0(%arg0: i32) -> (i32, i32) {
    %c0_i32 = arith.constant 0 : i32
    %c0_i32_0 = arith.constant 0 : i32
    %c0_i32_1 = arith.constant 0 : i32
    return %c0_i32, %c0_i32_0 : i32, i32
  }
  func.func @transform_1(%arg0: i32) -> (i32, i32) {
    %c0_i32 = arith.constant 0 : i32
    %c0_i32_0 = arith.constant 0 : i32
    return %arg0, %c0_i32 : i32, i32
  }
  func.func @transform_2(%arg0: i32) -> (i32, i32) {
    %c0_i32 = arith.constant 0 : i32
    %c0_i32_0 = arith.constant 0 : i32
    return %arg0, %c0_i32 : i32, i32
  }
}

</mosaic_0001>

<bundles_post_ra>
// kernel: sin.1
= control target key start
LH: loop header
LB: loop body
LE: loop exit
PB: predicated region body
PF: predicated region fallthrough
CT: control target
= control target key end

     0   :  { %v126_v12 = vmov 683565275   ;;  %v127_v14 = vmov 2475754826   ;;  %v128_v16 = vmov 2131351028   ;;  %s169_s0 = inlined_call_operand.vmem [shape: f32[3], index: 0, kind: input, shape index: {}]   ;;  %s170_s1 = inlined_call_operand.vmem [shape: f32[3], index: 1, kind: output, shape index: {}]  }
   0x1   :  { %v145_v0 = vld [vmem:[%s169_s0] sm:$0x1]  ;;  %v129_v18 = vmov 2102212464   ;;  %v130_v20 = vmov 920167782  }
   0x2   :  { %v6_v1 = vand.u32 2139095040, %v145_v0  ;;  %v3_v3 = vand.u32 2147483647, %v145_v0  ;;  %v131_v27 = vmov 1326507024   ;;  %vm5_vm7 = vcmp.lt.s32.totalorder %v145_v0, 0 }
   0x3   :  { %vm95_vm12 = vweird.f32 %v145_v0 }
   0x4   :  { %v7_v2 = vshrl.u32 %v6_v1, 23  ;;  %v10_v6 = vand.u32 8388607, %v3_v3  ;;  %vm4_vm8 = vcmp.le.f32.partialorder %v3_v3, 0.7853982 }
   0x6   :  { %v108_v4 = vadd.s32 4294967169, %v7_v2  ;;  %v11_v9 = vor.u32 8388608, %v10_v6 }
   0x8   :  { %v13_v5 = vadd.s32 1, %v108_v4  ;;  %v51_v29 = vshll.u32 %v11_v9, 8 }
   0xa   :  { %vm14_vm0 = vcmp.gt.s32.totalorder %v13_v5, 0 }
   0xb   :  { %v15_v7 = vsel %vm14_vm0, %v13_v5, 0 }
   0xc   :  { %v17_v8 = vand.u32 31, %v15_v7  ;;  %v16_v10 = vshrl.u32 %v15_v7, 5 }
   0xe   :  { %v18_v11 = vsub.s32 32, %v17_v8  ;;  %v20_v13 = vshll.u32 %v126_v12, %v17_v8  ;;  %v23_v15 = vshll.u32 %v127_v14, %v17_v8  ;;  %v26_v17 = vshll.u32 %v128_v16, %v17_v8 }
   0xf   :  { %v29_v19 = vshll.u32 %v129_v18, %v17_v8  ;;  %v32_v21 = vshll.u32 %v130_v20, %v17_v8  ;;  %vm35_vm1 = vcmp.lt.s32.totalorder %v16_v10, 1  ;;  %vm38_vm2 = vcmp.lt.s32.totalorder %v16_v10, 4 }
  0x10   :  { %v19_v22 = vshrl.u32 %v126_v12, %v18_v11  ;;  %v21_v23 = vshrl.u32 %v127_v14, %v18_v11  ;;  %v24_v24 = vshrl.u32 %v128_v16, %v18_v11  ;;  %v27_v25 = vshrl.u32 %v129_v18, %v18_v11 }
  0x11   :  { %v30_v26 = vshrl.u32 %v130_v20, %v18_v11  ;;  %v33_v28 = vshrl.u32 %v131_v27, %v18_v11  ;;  %vm36_vm3 = vcmp.lt.s32.totalorder %v16_v10, 2  ;;  %vm37_vm4 = vcmp.lt.s32.totalorder %v16_v10, 3 }
  0x12   :  { %v22_v30 = vor.u32 %v21_v23, %v20_v13  ;;  %v25_v31 = vor.u32 %v24_v24, %v23_v15  ;;  %v28_v32 = vor.u32 %v27_v25, %v26_v17 }
  0x13   :  { %v31_v33 = vor.u32 %v30_v26, %v29_v19  ;;  %v34_v34 = vor.u32 %v33_v28, %v32_v21 }
  0x14   :  { %v39_v35 = vsel %vm35_vm1, %v19_v22, %v22_v30  ;;  %v40_v36 = vsel %vm38_vm2, %v28_v32, 2102212464  ;;  %v43_v37 = vsel %vm35_vm1, %v22_v30, %v25_v31  ;;  %v47_v38 = vsel %vm35_vm1, %v25_v31, %v28_v32 }
  0x15   :  { %v41_v39 = vsel %vm37_vm4, %v25_v31, %v40_v36  ;;  %v44_v40 = vsel %vm38_vm2, %v31_v33, 920167782  ;;  %v48_v41 = vsel %vm38_vm2, %v34_v34, 1326507024 }
  0x16   :  { %v45_v42 = vsel %vm37_vm4, %v28_v32, %v44_v40  ;;  %v49_v43 = vsel %vm37_vm4, %v31_v33, %v48_v41  ;;  %v42_v44 = vsel %vm36_vm3, %v39_v35, %v41_v39 }
  0x17   :  { %v46_v45 = vsel %vm36_vm3, %v43_v37, %v45_v42  ;;  %v50_v46 = vsel %vm36_vm3, %v47_v38, %v49_v43  ;;  %v58_v51 = vmul.u32 %v51_v29, %v42_v44 }
  0x18   :  { %v151_v47 = vmul.u32.u64.low %v51_v29, %v50_v46  ;;  %v152_v48 = vmul.u32.u64.high %v51_v29, %v50_v46, %v151_v47  ;;  %v154_v49 = vmul.u32.u64.low %v51_v29, %v46_v45  ;;  %v155_v50 = vmul.u32.u64.high %v51_v29, %v46_v45, %v154_v49 }
  0x1a   :  { %vm60_vm5 = vc.u32 %v152_v48, %v154_v49  ;;  %v61_v52 = vadd.s32 1, %v155_v50  ;;  %v59_v63 = vadd.s32 %v154_v49, %v152_v48 }
  0x1c   :  { %v62_v53 = vsel %vm60_vm5, %v61_v52, %v155_v50 }
  0x1d   :  { %v63_v54 = vadd.s32 %v62_v53, %v58_v51 }
  0x1f   :  { %v64_v55 = vadd.s32 536870912, %v63_v54 }
  0x21   :  { %v65_v56 = vshrl.u32 %v64_v55, 30 }
  0x23   :  { %v66_v57 = vshll.u32 %v65_v56, 30  ;;  %v89_v14 = vsub.s32 4, %v65_v56 }
  0x25   :  { %v67_v58 = vsub.s32 %v63_v54, %v66_v57  ;;  %v90_v16 = vsel %vm5_vm7, %v89_v14, %v65_v56 }
  0x26   :  { %v92_v18 = vsel %vm4_vm8, 0, %v90_v16 }
  0x27   :  { %v69_v59 = vsub.s32 0, %v67_v58  ;;  %v96_v19 = vadd.s32 3, %v92_v18 }
  0x29   :  { %v109_v60 = vmin.u32 %v69_v59, %v67_v58  ;;  %v97_v20 = vand.u32 3, %v96_v19 }
  0x2b   :  { %v71_v61 = vclz %v109_v60  ;;  %vm102_vm9 = vcmp.eq.s32.totalorder %v97_v20, 2  ;;  %vm99_vm10 = vcmp.eq.s32.totalorder %v97_v20, 0  ;;  %vm98_vm11 = vcmp.lt.s32.totalorder %v97_v20, 2 }
  0x2d   :  { %v110_v62 = vadd.s32 4294967294, %v71_v61 }
  0x2f   :  { %vm111_vm6 = vcmp.lt.s32.totalorder %v110_v62, 0 }
  0x30   :  { %v74_v1 = vsel %vm111_vm6, 0, %v110_v62 }
  0x31   :  { %v75_v2 = vsub.s32 32, %v74_v1  ;;  %v76_v4 = vshll.u32 %v67_v58, %v74_v1  ;;  %v79_v5 = vsub.s32 4294967266, %v74_v1 }
  0x33   :  { %v77_v6 = vshrl.u32 %v59_v63, %v75_v2  ;;  %v80_v7 = vadd.s32 127, %v79_v5 }
  0x35   :  { %v78_v8 = vor.u32 %v77_v6, %v76_v4  ;;  %v81_v9 = vshll.u32 %v80_v7, 23 }
  0x37   :  { %v82_v10 = vor.u32 4788187, %v81_v9  ;;  %v85_v11 = vcvt.s32.f32 %v78_v8 }
  0x39   :  { %v83_v12 = vand.u32 2147483647, %v82_v10 }
  0x3b   :  { %v86_v13 = vmul.f32 %v85_v11, %v83_v12 }
  0x3d   :  { %v87_v3 = vxor.u32 2147483648, %v86_v13 }
  0x3f   :  { %v88_v15 = vsel %vm5_vm7, %v87_v3, %v86_v13 }
  0x40   :  { %v91_v17 = vsel %vm4_vm8, %v145_v0, %v88_v15 }
  0x41   :  { %122 = vcosq.f32 %v91_v17 }
  0x42   :  { %124 = vsinq.f32 %v91_v17 }
  0x4e   :  { %v123_v21 = vpop.eup %122 }
  0x4f   :  { %v125_v22 = vpop.eup %124  ;;  %v103_v23 = vxor.u32 2147483648, %v123_v21 }
  0x50   :  { %v100_v24 = vxor.u32 2147483648, %v125_v22 }
  0x51   :  { %v104_v0 = vsel %vm102_vm9, %v103_v23, %v125_v22 }
  0x52   :  { %v101_v25 = vsel %vm99_vm10, %v123_v21, %v100_v24 }
  0x53   :  { %v105_v26 = vsel %vm98_vm11, %v101_v25, %v104_v0 }
  0x54   :  { %v106_v27 = vsel %vm95_vm12, nan, %v105_v26 }
  0x55   :  { %107 = vst [vmem:[%s170_s1] sm:$0x1] %v106_v27 }

// kernel: cos.1
= control target key start
LH: loop header
LB: loop body
LE: loop exit
PB: predicated region body
PF: predicated region fallthrough
CT: control target
= control target key end

     0   :  { %v127_v12 = vmov 683565275   ;;  %v128_v14 = vmov 2475754826   ;;  %v129_v16 = vmov 2131351028   ;;  %s171_s0 = inlined_call_operand.vmem [shape: f32[3], index: 0, kind: input, shape index: {}]   ;;  %s172_s1 = inlined_call_operand.vmem [shape: bf16[3], index: 1, kind: output, shape index: {}]  }
   0x1   :  { %v147_v0 = vld [vmem:[%s171_s0] sm:$0x1]  ;;  %v130_v18 = vmov 2102212464   ;;  %v131_v20 = vmov 920167782  }
   0x2   :  { %v6_v1 = vand.u32 2139095040, %v147_v0  ;;  %v3_v3 = vand.u32 2147483647, %v147_v0  ;;  %v132_v27 = vmov 1326507024   ;;  %vm5_vm7 = vcmp.lt.s32.totalorder %v147_v0, 0 }
   0x3   :  { %vm95_vm12 = vweird.f32 %v147_v0 }
   0x4   :  { %v7_v2 = vshrl.u32 %v6_v1, 23  ;;  %v10_v6 = vand.u32 8388607, %v3_v3  ;;  %vm4_vm8 = vcmp.le.f32.partialorder %v3_v3, 0.7853982 }
   0x6   :  { %v108_v4 = vadd.s32 4294967169, %v7_v2  ;;  %v11_v9 = vor.u32 8388608, %v10_v6 }
   0x8   :  { %v13_v5 = vadd.s32 1, %v108_v4  ;;  %v51_v29 = vshll.u32 %v11_v9, 8 }
   0xa   :  { %vm14_vm0 = vcmp.gt.s32.totalorder %v13_v5, 0 }
   0xb   :  { %v15_v7 = vsel %vm14_vm0, %v13_v5, 0 }
   0xc   :  { %v17_v8 = vand.u32 31, %v15_v7  ;;  %v16_v10 = vshrl.u32 %v15_v7, 5 }
   0xe   :  { %v18_v11 = vsub.s32 32, %v17_v8  ;;  %v20_v13 = vshll.u32 %v127_v12, %v17_v8  ;;  %v23_v15 = vshll.u32 %v128_v14, %v17_v8  ;;  %v26_v17 = vshll.u32 %v129_v16, %v17_v8 }
   0xf   :  { %v29_v19 = vshll.u32 %v130_v18, %v17_v8  ;;  %v32_v21 = vshll.u32 %v131_v20, %v17_v8  ;;  %vm35_vm1 = vcmp.lt.s32.totalorder %v16_v10, 1  ;;  %vm38_vm2 = vcmp.lt.s32.totalorder %v16_v10, 4 }
  0x10   :  { %v19_v22 = vshrl.u32 %v127_v12, %v18_v11  ;;  %v21_v23 = vshrl.u32 %v128_v14, %v18_v11  ;;  %v24_v24 = vshrl.u32 %v129_v16, %v18_v11  ;;  %v27_v25 = vshrl.u32 %v130_v18, %v18_v11 }
  0x11   :  { %v30_v26 = vshrl.u32 %v131_v20, %v18_v11  ;;  %v33_v28 = vshrl.u32 %v132_v27, %v18_v11  ;;  %vm36_vm3 = vcmp.lt.s32.totalorder %v16_v10, 2  ;;  %vm37_vm4 = vcmp.lt.s32.totalorder %v16_v10, 3 }
  0x12   :  { %v22_v30 = vor.u32 %v21_v23, %v20_v13  ;;  %v25_v31 = vor.u32 %v24_v24, %v23_v15  ;;  %v28_v32 = vor.u32 %v27_v25, %v26_v17  ;;  %v133_v27 = vmov 0.0  }
  0x13   :  { %v31_v33 = vor.u32 %v30_v26, %v29_v19  ;;  %v34_v34 = vor.u32 %v33_v28, %v32_v21 }
  0x14   :  { %v39_v35 = vsel %vm35_vm1, %v19_v22, %v22_v30  ;;  %v40_v36 = vsel %vm38_vm2, %v28_v32, 2102212464  ;;  %v43_v37 = vsel %vm35_vm1, %v22_v30, %v25_v31  ;;  %v47_v38 = vsel %vm35_vm1, %v25_v31, %v28_v32 }
  0x15   :  { %v41_v39 = vsel %vm37_vm4, %v25_v31, %v40_v36  ;;  %v44_v40 = vsel %vm38_vm2, %v31_v33, 920167782  ;;  %v48_v41 = vsel %vm38_vm2, %v34_v34, 1326507024 }
  0x16   :  { %v45_v42 = vsel %vm37_vm4, %v28_v32, %v44_v40  ;;  %v49_v43 = vsel %vm37_vm4, %v31_v33, %v48_v41  ;;  %v42_v44 = vsel %vm36_vm3, %v39_v35, %v41_v39 }
  0x17   :  { %v46_v45 = vsel %vm36_vm3, %v43_v37, %v45_v42  ;;  %v50_v46 = vsel %vm36_vm3, %v47_v38, %v49_v43  ;;  %v58_v51 = vmul.u32 %v51_v29, %v42_v44 }
  0x18   :  { %v153_v47 = vmul.u32.u64.low %v51_v29, %v50_v46  ;;  %v154_v48 = vmul.u32.u64.high %v51_v29, %v50_v46, %v153_v47  ;;  %v156_v49 = vmul.u32.u64.low %v51_v29, %v46_v45  ;;  %v157_v50 = vmul.u32.u64.high %v51_v29, %v46_v45, %v156_v49 }
  0x1a   :  { %vm60_vm5 = vc.u32 %v154_v48, %v156_v49  ;;  %v61_v52 = vadd.s32 1, %v157_v50  ;;  %v59_v63 = vadd.s32 %v156_v49, %v154_v48 }
  0x1c   :  { %v62_v53 = vsel %vm60_vm5, %v61_v52, %v157_v50 }
  0x1d   :  { %v63_v54 = vadd.s32 %v62_v53, %v58_v51 }
  0x1f   :  { %v64_v55 = vadd.s32 536870912, %v63_v54 }
  0x21   :  { %v65_v56 = vshrl.u32 %v64_v55, 30 }
  0x23   :  { %v66_v57 = vshll.u32 %v65_v56, 30  ;;  %v89_v15 = vsub.s32 4, %v65_v56 }
  0x25   :  { %v67_v58 = vsub.s32 %v63_v54, %v66_v57  ;;  %v90_v17 = vsel %vm5_vm7, %v89_v15, %v65_v56 }
  0x26   :  { %v92_v18 = vsel %vm4_vm8, 0, %v90_v17 }
  0x27   :  { %v69_v59 = vsub.s32 0, %v67_v58  ;;  %v96_v19 = vand.u32 3, %v92_v18 }
  0x29   :  { %v109_v60 = vmin.u32 %v69_v59, %v67_v58  ;;  %vm101_vm9 = vcmp.eq.s32.totalorder %v96_v19, 2  ;;  %vm98_vm10 = vcmp.eq.s32.totalorder %v96_v19, 0  ;;  %vm97_vm11 = vcmp.lt.s32.totalorder %v96_v19, 2 }
  0x2b   :  { %v71_v61 = vclz %v109_v60 }
  0x2d   :  { %v110_v62 = vadd.s32 4294967294, %v71_v61 }
  0x2f   :  { %vm111_vm6 = vcmp.lt.s32.totalorder %v110_v62, 0 }
  0x30   :  { %v74_v1 = vsel %vm111_vm6, 0, %v110_v62 }
  0x31   :  { %v75_v2 = vsub.s32 32, %v74_v1  ;;  %v76_v4 = vshll.u32 %v67_v58, %v74_v1  ;;  %v79_v5 = vsub.s32 4294967266, %v74_v1 }
  0x33   :  { %v77_v6 = vshrl.u32 %v59_v63, %v75_v2  ;;  %v80_v7 = vadd.s32 127, %v79_v5 }
  0x35   :  { %v78_v8 = vor.u32 %v77_v6, %v76_v4  ;;  %v81_v9 = vshll.u32 %v80_v7, 23 }
  0x37   :  { %v82_v10 = vor.u32 4788187, %v81_v9  ;;  %v85_v11 = vcvt.s32.f32 %v78_v8 }
  0x39   :  { %v83_v12 = vand.u32 2147483647, %v82_v10 }
  0x3b   :  { %v86_v13 = vmul.f32 %v85_v11, %v83_v12 }
  0x3d   :  { %v87_v3 = vxor.u32 2147483648, %v86_v13 }
  0x3f   :  { %v88_v14 = vsel %vm5_vm7, %v87_v3, %v86_v13 }
  0x40   :  { %v91_v16 = vsel %vm4_vm8, %v147_v0, %v88_v14 }
  0x41   :  { %123 = vcosq.f32 %v91_v16 }
  0x42   :  { %125 = vsinq.f32 %v91_v16 }
  0x4e   :  { %v124_v20 = vpop.eup %123 }
  0x4f   :  { %v126_v21 = vpop.eup %125  ;;  %v102_v22 = vxor.u32 2147483648, %v124_v20 }
  0x50   :  { %v99_v23 = vxor.u32 2147483648, %v126_v21 }
  0x51   :  { %v103_v0 = vsel %vm101_vm9, %v102_v22, %v126_v21 }
  0x52   :  { %v100_v24 = vsel %vm98_vm10, %v124_v20, %v99_v23 }
  0x53   :  { %v104_v25 = vsel %vm97_vm11, %v100_v24, %v103_v0 }
  0x54   :  { %v105_v26 = vsel %vm95_vm12, nan, %v104_v25 }
  0x55   :  { %v106_v28 = vpack.c.bf16 %v133_v27, %v105_v26 }
  0x57   :  { %107 = vst [vmem:[%s172_s1] sm:$0x1] %v106_v28 }

// kernel: _transform_forward.1
= control target key start
LH: loop header
LB: loop body
LE: loop exit
PB: predicated region body
PF: predicated region fallthrough
CT: control target
= control target key end

     0   :  { %s178_s13 = smov 2   ;;  %s179_s14 = smov 1   ;;  %v25_v3 = vlaneseq  ;;  %s280_s1 = inlined_call_operand.vmem [shape: f32[4,384], index: 1, kind: input, shape index: {}]   ;;  %s281_s0 = inlined_call_operand.vmem [shape: f32[6,384], index: 0, kind: input, shape index: {}]   ;;  %s282_s2 = inlined_call_operand.vmem [shape: f32[4,384], index: 2, kind: output, shape index: {}]  }
   0x1   :  { %v200_v0 = vld [vmem:[%s280_s1 + $0x8] sm:$0xf]  ;;  %v11_v1 = vld [vmem:[%s280_s1] sm:$0xff]  ;;  %s180_s15 = smov 127   ;;  %s181_s16 = smov 126  }
   0x2   :  { %23 = vrot.lane.b32.xlu1 %v200_v0, %s178_s13  ;;  %19 = vrot.lane.b32.xlu0 %v11_v1, %s178_s13  ;;  %v206_v2 = vcombine.high %v11_v1, %v11_v1  ;;  %v32_v4 = vshrl.u32 %v25_v3, 7  ;;  %v215_v6 = vand.u32 127, %v25_v3  ;;  %v220_v10 = vld [vmem:[%s281_s0] sm:$0x3f]  ;;  %v227_v15 = vld [vmem:[%s281_s0 + $0x8] sm:$0x3f] }
   0x3   :  { %v236_v18 = vld [vmem:[%s281_s0 + $0x10] sm:$0x3f] }
   0x4   :  { %v33_v8 = vsub.s32 0, %v32_v4  ;;  %v58_v9 = vsub.s32 1, %v32_v4  ;;  %vm27_vm0 = vcmp.lt.s32.totalorder %v215_v6, 2  ;;  %v76_v13 = vsub.s32 2, %v32_v4 }
   0x5   :  { %vm52_vm1 = vcmp.lt.s32.totalorder %v215_v6, 1  ;;  %v104_v20 = vsub.s32 3, %v32_v4  ;;  %vm98_vm2 = vcmp.lt.s32.totalorder %v215_v6, 127  ;;  %v132_v45 = vsub.s32 4, %v32_v4 }
   0x6   :  { %46 = vrot.lane.b32.xlu1 %v11_v1, %s179_s14  ;;  %21 = vrot.lane.b32.xlu0 %v206_v2, %s178_s13  ;;  %v34_v14 = vrot.slane %v220_v10, %v33_v8  ;;  %v59_v16 = vrot.slane %v220_v10, %v58_v9  ;;  %v63_v19 = vrot.slane %v227_v15, %v58_v9  ;;  %v150_v51 = vsub.s32 5, %v32_v4 }
   0x7   :  { %v67_v23 = vrot.slane %v236_v18, %v58_v9  ;;  %v77_v24 = vrot.slane %v220_v10, %v76_v13  ;;  %v38_v25 = vrot.slane %v227_v15, %v33_v8  ;;  %v42_v31 = vrot.slane %v236_v18, %v33_v8 }
   0x8   :  { %v105_v35 = vrot.slane %v220_v10, %v104_v20  ;;  %v81_v36 = vrot.slane %v227_v15, %v76_v13  ;;  %v85_v42 = vrot.slane %v236_v18, %v76_v13  ;;  %v109_v47 = vrot.slane %v227_v15, %v104_v20 }
   0x9   :  { %v86_v41 = vmul.f32 %v77_v24, %v11_v1  ;;  %v113_v48 = vrot.slane %v236_v18, %v104_v20  ;;  %vm126_vm3 = vcmp.lt.s32.totalorder %v215_v6, 126  ;;  %v141_v60 = vrot.slane %v236_v18, %v132_v45 }
   0xa   :  { %50 = vrot.lane.b32.xlu1 %v200_v0, %s179_s14  ;;  %48 = vrot.lane.b32.xlu0 %v206_v2, %s179_s14  ;;  %v87_v50 = vmul.f32 %v81_v36, %v206_v2  ;;  %v88_v57 = vmul.f32 %v85_v42, %v200_v0  ;;  %v133_v63 = vrot.slane %v220_v10, %v132_v45 }
   0xb   :  { %v159_v3 = vrot.slane %v236_v18, %v150_v51  ;;  %v151_v8 = vrot.slane %v220_v10, %v150_v51  ;;  %v155_v9 = vrot.slane %v227_v15, %v150_v51 }
   0xe   :  { %94 = vrot.lane.b32.xlu1 %v206_v2, %s180_s15  ;;  %92 = vrot.lane.b32.xlu0 %v11_v1, %s180_s15 }
  0x12   :  { %120 = vrot.lane.b32.xlu1 %v11_v1, %s181_s16  ;;  %96 = vrot.lane.b32.xlu0 %v200_v0, %s180_s15  ;;  %v137_v1 = vrot.slane %v227_v15, %v132_v45 }
  0x16   :  { %124 = vrot.lane.b32.xlu1 %v200_v0, %s181_s16  ;;  %122 = vrot.lane.b32.xlu0 %v206_v2, %s181_s16 }
  0x74   :  { %v24_v5 = vpop.permute.xlu1 %23  ;;  %v20_v7 = vpop.permute.xlu0 %19 }
  0x75   :  { %v30_v17 = vsel %vm27_vm0, %v24_v5, %v20_v7 }
  0x76   :  { %v43_v29 = vmul.f32 %v34_v14, %v30_v17 }
  0x78   :  { %v47_v11 = vpop.permute.xlu1 %46  ;;  %v22_v12 = vpop.permute.xlu0 %21 }
  0x79   :  { %v29_v30 = vsel %vm27_vm0, %v20_v7, %v22_v12  ;;  %v28_v33 = vsel %vm27_vm0, %v22_v12, %v24_v5 }
  0x7a   :  { %v44_v43 = vmul.f32 %v38_v25, %v29_v30  ;;  %v45_v46 = vmul.f32 %v42_v31, %v28_v33 }
  0x7c   :  { %v51_v21 = vpop.permute.xlu1 %50  ;;  %v49_v22 = vpop.permute.xlu0 %48 }
  0x7d   :  { %v55_v26 = vsel %vm52_vm1, %v51_v21, %v47_v11  ;;  %v53_v27 = vsel %vm52_vm1, %v49_v22, %v51_v21  ;;  %v54_v28 = vsel %vm52_vm1, %v47_v11, %v49_v22 }
  0x7e   :  { %v68_v32 = vmul.f32 %v59_v16, %v55_v26  ;;  %v69_v34 = vmul.f32 %v63_v19, %v54_v28  ;;  %v70_v38 = vmul.f32 %v67_v23, %v53_v27 }
  0x80   :  { %v71_v37 = vadd.f32 %v68_v32, %v43_v29  ;;  %v95_v39 = vpop.permute.xlu1 %94  ;;  %v93_v40 = vpop.permute.xlu0 %92  ;;  %v72_v49 = vadd.f32 %v69_v34, %v44_v43  ;;  %v73_v52 = vadd.f32 %v70_v38, %v45_v46 }
  0x81   :  { %v100_v44 = vsel %vm98_vm2, %v93_v40, %v95_v39 }
  0x82   :  { %v89_v53 = vadd.f32 %v86_v41, %v71_v37  ;;  %v114_v54 = vmul.f32 %v105_v35, %v100_v44  ;;  %v90_v2 = vadd.f32 %v87_v50, %v72_v49  ;;  %v91_v4 = vadd.f32 %v88_v57, %v73_v52 }
  0x84   :  { %v121_v55 = vpop.permute.xlu1 %120  ;;  %v97_v56 = vpop.permute.xlu0 %96  ;;  %v117_v0 = vadd.f32 %v114_v54, %v89_v53 }
  0x85   :  { %v99_v58 = vsel %vm98_vm2, %v95_v39, %v97_v56  ;;  %v101_v59 = vsel %vm98_vm2, %v97_v56, %v93_v40 }
  0x86   :  { %v115_v61 = vmul.f32 %v109_v47, %v99_v58  ;;  %v116_v62 = vmul.f32 %v113_v48, %v101_v59 }
  0x88   :  { %v125_v5 = vpop.permute.xlu1 %124  ;;  %v123_v7 = vpop.permute.xlu0 %122  ;;  %v118_v11 = vadd.f32 %v115_v61, %v90_v2  ;;  %v119_v16 = vadd.f32 %v116_v62, %v91_v4 }
  0x89   :  { %v129_v12 = vsel %vm126_vm3, %v125_v5, %v121_v55  ;;  %v127_v13 = vsel %vm126_vm3, %v123_v7, %v125_v5  ;;  %v128_v14 = vsel %vm126_vm3, %v121_v55, %v123_v7 }
  0x8a   :  { %v144_v17 = vmul.f32 %v141_v60, %v129_v12  ;;  %v142_v18 = vmul.f32 %v133_v63, %v128_v14  ;;  %v143_v19 = vmul.f32 %v137_v1, %v127_v13 }
  0x8c   :  { %v147_v20 = vadd.f32 %v144_v17, %v119_v16  ;;  %v145_v21 = vadd.f32 %v142_v18, %v117_v0  ;;  %v146_v22 = vadd.f32 %v143_v19, %v118_v11 }
  0x8e   :  { %v162_v10 = vadd.f32 %v159_v3, %v147_v20  ;;  %v160_v23 = vadd.f32 %v151_v8, %v145_v21  ;;  %v161_v15 = vadd.f32 %v155_v9, %v146_v22 }
  0x90   :  { %168 = vst [vmem:[%s282_s2 + $0x8] sm:$0xf] %v162_v10  ;;  %v165_v24 = vcombine.low %v160_v23, %v161_v15 }
  0x92   :  { %167 = vst [vmem:[%s282_s2] sm:$0xff] %v165_v24 }

</bundles_post_ra>
